<compile_context>
chip_gen: v7x
topology: tpu7x:2x2x1
jax: 0.10.0
libtpu: 0.0.40
codegen_flags: <defaults>
</compile_context>

<pallas_src>
import functools
import math

import jax
import jax.numpy as jnp
import numpy as np
from jax import lax
from jax.experimental import pallas as pl
from jax.experimental.pallas import tpu as pltpu

_LANES = 128
_CHUNK_ROWS = 64                       # compute chunk: 8 vregs per coord plane
_MAX_BATCH_TILE = 32                   # max batches packed per grid step (small-N regime)
_VMEM_POINT_BUDGET = 6 * 1024 * 1024   # double-buffered points budget (portable v5e/v6e/v7x)


def _round_up(x, m):
    return ((x + m - 1) // m) * m


def _default_max_tile_sublanes():
    # Larger N-tiles on v6e/v7x (32 MiB scoped-VMEM default); 2048 rows (6 MiB
    # double-buffered) on v5e / unknown chips (16 MiB scoped-VMEM default).
    try:
        kind = jax.devices()[0].device_kind.lower()
    except Exception:
        return 2048
    if "v6" in kind or "v7" in kind:
        return 4096
    return 2048


def _ellipsoid_kernel(c_ref, qinv_ref, pts_ref, out_ref, acc_ref, *,
                      batch_tile, chunk_rows, num_chunks, single_step):
    """One (batch-group, N-split, N-tile) grid step.

    c_ref    : SMEM (Bpad*3,)   flat predicted centers [cx, cy, cz] * B
    qinv_ref : SMEM (Bpad*6,)   [q00, 2*q01, 2*q02, q11, 2*q12, q22] * B
    pts_ref  : VMEM (bt, 3, tile_rows, 128)  coord-major, zero-padded point tile
    out_ref  : VMEM (1, 1, bt, 4, 128)       per-batch [sum_x, sum_y, sum_z, viol_sum]
    acc_ref  : VMEM (bt, 4, 8, 128)          running vector accumulators across N-tiles
    """
    g = pl.program_id(0)
    t = pl.program_id(2)

    if not single_step:
        @pl.when(t == 0)
        def _init():
            acc_ref[...] = jnp.zeros_like(acc_ref)

    folds = chunk_rows // 8

    def _fold8(a):
        # (chunk_rows, 128) -> (8, 128) using only VALU adds (static sublane slices).
        r = a[0:8, :]
        for f in range(1, folds):
            r = r + a[8 * f:8 * (f + 1), :]
        return r

    zero = jnp.zeros((8, _LANES), jnp.float32)

    for j in range(batch_tile):                      # static unroll over packed batches
        b = g * batch_tile + j
        cx = c_ref[3 * b + 0]
        cy = c_ref[3 * b + 1]
        cz = c_ref[3 * b + 2]
        q00 = qinv_ref[6 * b + 0]
        q01p = qinv_ref[6 * b + 1]                   # pre-doubled off-diagonals
        q02p = qinv_ref[6 * b + 2]
        q11 = qinv_ref[6 * b + 3]
        q12p = qinv_ref[6 * b + 4]
        q22 = qinv_ref[6 * b + 5]

        def compute_chunk(off, carry):
            sx, sy, sz, sv = carry
            px = pts_ref[j, 0, pl.ds(off, chunk_rows), :]
            py = pts_ref[j, 1, pl.ds(off, chunk_rows), :]
            pz = pts_ref[j, 2, pl.ds(off, chunk_rows), :]
            sx = sx + _fold8(px)
            sy = sy + _fold8(py)
            sz = sz + _fold8(pz)
            dx = px - cx
            dy = py - cy
            dz = pz - cz
            eq = (dx * (q00 * dx + q01p * dy + q02p * dz)
                  + dy * (q11 * dy + q12p * dz)
                  + q22 * (dz * dz))
            sv = sv + _fold8(jnp.maximum(eq - 1.0, 0.0))
            return sx, sy, sz, sv

        if num_chunks == 1:
            sx, sy, sz, sv = compute_chunk(0, (zero, zero, zero, zero))
        else:
            sx, sy, sz, sv = lax.fori_loop(
                0, num_chunks,
                lambda i, c: compute_chunk(
                    pl.multiple_of(i * chunk_rows, chunk_rows), c),
                (zero, zero, zero, zero))

        if single_step:
            # Only one N-tile per (group, split): write the reduced sums directly.
            for k, v in enumerate((sx, sy, sz, sv)):
                out_ref[0, 0, j, k:k + 1, :] = jnp.full(
                    (1, _LANES), jnp.sum(v), jnp.float32)
        else:
            acc_ref[j, 0, :, :] += sx
            acc_ref[j, 1, :, :] += sy
            acc_ref[j, 2, :, :] += sz
            acc_ref[j, 3, :, :] += sv

    if not single_step:
        @pl.when(t == pl.num_programs(2) - 1)
        def _finalize():
            for j in range(batch_tile):
                for k in range(4):
                    out_ref[0, 0, j, k:k + 1, :] = jnp.full(
                        (1, _LANES), jnp.sum(acc_ref[j, k, :, :]), jnp.float32)


def _build_Q(pred_params):
    Q11, Q12, Q13, Q22, Q23, Q33 = [pred_params[:, 3 + i] for i in range(6)]
    return jnp.stack(
        [jnp.stack([Q11, Q12, Q13], -1),
         jnp.stack([Q12, Q22, Q23], -1),
         jnp.stack([Q13, Q23, Q33], -1)],
        axis=1)                                      # (B, 3, 3) symmetric


def ellipsoid_loss(pred_params, points,
                   center_weight=1.0, containment_weight=1.0, volume_weight=1.0,
                   max_tile_sublanes=None):
    """JAX/Pallas equivalent of EllipsoidLoss.forward.

    pred_params: (B, 9) float32, points: (B, N, 3) float32.
    Returns (total_loss, loss_dict). As in the PyTorch code, the volume term is
    per-batch, so total_loss has shape (B,).
    """
    pred_params = pred_params.astype(jnp.float32)
    points = points.astype(jnp.float32)
    B, N, _ = points.shape

    pred_center = pred_params[:, :3]                 # (B, 3)
    Q = _build_Q(pred_params)                        # (B, 3, 3)
    Qinv = jnp.linalg.inv(Q)                         # glue: tiny 3x3 per batch
    detQ = jnp.linalg.det(Q)                         # glue: tiny 3x3 per batch

    # Unique entries of the symmetric inverse, off-diagonals pre-doubled so the
    # in-kernel quadratic form needs no 2x multiplies.
    qinv6 = jnp.stack([
        Qinv[:, 0, 0],
        Qinv[:, 0, 1] + Qinv[:, 1, 0],
        Qinv[:, 0, 2] + Qinv[:, 2, 0],
        Qinv[:, 1, 1],
        Qinv[:, 1, 2] + Qinv[:, 2, 1],
        Qinv[:, 2, 2],
    ], axis=1)                                       # (B, 6)

    # ---- tiling choices ---------------------------------------------------
    max_tile = _round_up(max_tile_sublanes or _default_max_tile_sublanes(), 8)
    rows = _round_up(max(1, -(-N // _LANES)), 8)     # sublane rows needed (mult of 8)
    tiles_total = -(-rows // max_tile)
    if tiles_total == 1:
        num_splits, num_t = 1, 1
        tile_rows_raw = rows
    else:
        num_splits = 2 if B == 1 else 1              # keep both v7x TCs busy for B == 1
        num_t = -(-tiles_total // num_splits)
        tile_rows_raw = -(-rows // (num_splits * num_t))
    if tile_rows_raw >= _CHUNK_ROWS:
        tile_rows = _round_up(tile_rows_raw, _CHUNK_ROWS)
        chunk_rows = _CHUNK_ROWS
    else:
        tile_rows = _round_up(tile_rows_raw, 8)
        chunk_rows = tile_rows
    num_chunks = tile_rows // chunk_rows
    s_total = num_splits * num_t * tile_rows
    npad = s_total * _LANES
    single_step = (num_t == 1)

    per_block_bytes = 3 * tile_rows * _LANES * 4
    if tiles_total == 1:
        bt = max(1, min(B, _MAX_BATCH_TILE,
                        _VMEM_POINT_BUDGET // (2 * per_block_bytes)))
        if B >= 2:                                   # keep >= 2 groups for v7x megacore
            bt = min(bt, -(-B // 2))
    else:
        bt = 1
    bpad = _round_up(B, bt)
    num_groups = bpad // bt

    # Coord-major, zero-padded, lane-dense points: (Bpad, 3, S, 128).
    pts_t = jnp.transpose(points, (0, 2, 1))         # (B, 3, N)
    pts_t = jnp.pad(pts_t, ((0, bpad - B), (0, 0), (0, npad - N)))
    pts_t = pts_t.reshape(bpad, 3, s_total, _LANES)

    c_flat = jnp.pad(pred_center, ((0, bpad - B), (0, 0))).reshape(-1)   # (Bpad*3,)
    qinv_flat = jnp.pad(qinv6, ((0, bpad - B), (0, 0))).reshape(-1)      # (Bpad*6,)

    kernel = functools.partial(
        _ellipsoid_kernel, batch_tile=bt, chunk_rows=chunk_rows,
        num_chunks=num_chunks, single_step=single_step)

    cost = pl.CostEstimate(
        flops=int(25 * bpad * npad),
        transcendentals=0,
        bytes_accessed=int(bpad * 3 * npad * 4
                           + num_groups * num_splits * bt * 4 * _LANES * 4
                           + bpad * 9 * 4))

    sums = pl.pallas_call(
        kernel,
        out_shape=jax.ShapeDtypeStruct((num_groups, num_splits, bt, 4, _LANES),
                                       jnp.float32),
        grid_spec=pltpu.PrefetchScalarGridSpec(
            num_scalar_prefetch=0,
            grid=(num_groups, num_splits, num_t),
            in_specs=[
                pl.BlockSpec(memory_space=pltpu.MemorySpace.SMEM),   # centers (Bpad*3,)
                pl.BlockSpec(memory_space=pltpu.MemorySpace.SMEM),   # Qinv6   (Bpad*6,)
                pl.BlockSpec((bt, 3, tile_rows, _LANES),
                             lambda g, s, t: (g, 0, s * num_t + t, 0)),
            ],
            out_specs=pl.BlockSpec((1, 1, bt, 4, _LANES),
                                   lambda g, s, t: (g, s, 0, 0, 0)),
            scratch_shapes=[pltpu.VMEM((bt, 4, 8, _LANES), jnp.float32)],
        ),
        compiler_params=pltpu.CompilerParams(
            dimension_semantics=("parallel", "parallel", "arbitrary"),
            allow_input_fusion=[False, False, True]),
        cost_estimate=cost,
    )(c_flat, qinv_flat, pts_t)

    # ---- tiny per-batch epilogue (B x 4 values) ---------------------------
    sums = jnp.sum(sums, axis=1)                     # sum over N-splits
    sums = sums[..., 0].reshape(bpad, 4)[:B]         # (B, 4): [sx, sy, sz, viol]

    true_center = sums[:, :3] / jnp.float32(N)
    center_loss = jnp.mean(jnp.linalg.norm(pred_center - true_center, axis=1))

    # Each zero-padded point contributed relu(c^T Qinv c - 1); subtract it.
    cQc = jnp.einsum("bi,bij,bj->b", pred_center, Qinv, pred_center)
    pad_fix = jnp.float32(npad - N) * jnp.maximum(cQc - 1.0, 0.0)
    contain_loss = jnp.sum(sums[:, 3] - pad_fix) / jnp.float32(B * N)

    vol_loss = (4.0 / 3.0) * math.pi * detQ          # (B,), same as torch.det
    total_loss = (center_weight * center_loss
                  + containment_weight * contain_loss
                  + volume_weight * vol_loss)        # (B,)

    # TODO(synk): PyTorch's .item() calls in loss_dict only work for B == 1;
    # we return the arrays/scalars directly instead.
    loss_dict = {"center_loss": center_loss,
                 "containment_loss": contain_loss,
                 "volume_loss": vol_loss,
                 "total_loss": total_loss}
    return total_loss, loss_dict


def ellipsoid_loss_ref(pred_params, points,
                       center_weight=1.0, containment_weight=1.0, volume_weight=1.0):
    """Pure-JAX reference mirroring the PyTorch module."""
    pred_params = pred_params.astype(jnp.float32)
    points = points.astype(jnp.float32)
    c = pred_params[:, :3]
    Q = _build_Q(pred_params)

    true_center = jnp.mean(points, axis=1)
    center_loss = jnp.mean(jnp.linalg.norm(c - true_center, axis=1))

    d = points - c[:, None, :]
    Qinv = jnp.linalg.inv(Q)
    eq = jnp.einsum("bni,bij,bnj->bn", d, Qinv, d)
    contain_loss = jnp.mean(jnp.maximum(eq - 1.0, 0.0))

    vol_loss = (4.0 / 3.0) * jnp.pi * jnp.linalg.det(Q)
    total = (center_weight * center_loss
             + containment_weight * contain_loss
             + volume_weight * vol_loss)
    return total, {}


def _make_inputs(key, B, N):
    k1, k2, k3, k4 = jax.random.split(key, 4)
    centers = 0.5 * jax.random.normal(k1, (B, 3))
    diag = 2.0 + jax.random.uniform(k2, (B, 3))
    offd = 0.1 * jax.random.normal(k3, (B, 3))
    pred_params = jnp.concatenate(
        [centers,
         diag[:, 0:1], offd[:, 0:1], offd[:, 1:2],
         diag[:, 1:2], offd[:, 2:3], diag[:, 2:3]],
        axis=1,
    ).astype(jnp.float32)                            # (B, 9): [cx,cy,cz,Q11..Q33]
    points = jax.random.normal(k4, (B, N, 3), dtype=jnp.float32)
    return pred_params, points


if __name__ == "__main__":
    key = jax.random.PRNGKey(0)
    # (2, 64)     : batch groups on the parallel axis, single N-tile.
    # (10, 100)   : batch packing (bt=5) + batch padding + two groups.
    # (1, 40000)  : single-step path with the chunked fori_loop (5 x 64-row chunks).
    # (1, 5000, max_tile=8): forces the multi-tile accumulator + N-split path.
    cases = [
        dict(B=2, N=64),
        dict(B=10, N=100),
        dict(B=1, N=40000),
        dict(B=1, N=5000, max_tile_sublanes=8),
    ]
    for case in cases:
        key, sub = jax.random.split(key)
        pred_params, points = _make_inputs(sub, case["B"], case["N"])

        total, loss_dict = ellipsoid_loss(
            pred_params, points,
            max_tile_sublanes=case.get("max_tile_sublanes"))
        total = jax.block_until_ready(total)

        ref_total, _ = ellipsoid_loss_ref(pred_params, points)
        ref_total = jax.block_until_ready(ref_total)

        assert np.allclose(np.asarray(total), np.asarray(ref_total),
                           rtol=1e-4, atol=1e-4), (case, total, ref_total)
    print("KERNEL_OK")
</pallas_src>

<mosaic_0001>
module attributes {stable_mosaic.version = 11 : i64} {
  func.func @_ellipsoid_kernel(%arg0: i32, %arg1: i32, %arg2: i32, %arg3: memref<6xf32, #tpu.memory_space<smem>>, %arg4: memref<12xf32, #tpu.memory_space<smem>>, %arg5: memref<1x3x8x128xf32, #tpu.memory_space<vmem>>, %arg6: memref<1x1x1x4x128xf32, #tpu.memory_space<vmem>>, %arg7: memref<1x4x8x128xf32, #tpu.memory_space<vmem>>) attributes {dimension_semantics = [#tpu.dimension_semantics<parallel>, #tpu.dimension_semantics<parallel>, #tpu.dimension_semantics<arbitrary>], iteration_bounds = array<i64: 2, 1, 1>, scalar_prefetch = 0 : i64, scratch_operands = 1 : i64, tpu.core_type = #tpu.core_type<tc>, window_params = [{transform_indices = @transform_0, window_bounds = array<i64: 6>}, {transform_indices = @transform_1, window_bounds = array<i64: 12>}, {transform_indices = @transform_2, window_bounds = array<i64: 1, 3, 8, 128>}, {transform_indices = @transform_3, window_bounds = array<i64: 1, 1, 1, 4, 128>}]} {
    %cst = arith.constant 0.000000e+00 : f32
    %0 = vector.broadcast %cst : f32 to vector<8x128xf32>
    %c1_i32 = arith.constant 1 : i32
    %1 = arith.muli %arg0, %c1_i32 : i32
    %c0_i32 = arith.constant 0 : i32
    %2 = arith.addi %1, %c0_i32 : i32
    %c3_i32 = arith.constant 3 : i32
    %3 = arith.muli %c3_i32, %2 : i32
    %c0_i32_0 = arith.constant 0 : i32
    %4 = arith.addi %3, %c0_i32_0 : i32
    %5 = arith.index_cast %4 : i32 to index
    %6 = memref.load %arg3[%5] : memref<6xf32, #tpu.memory_space<smem>>
    %c3_i32_1 = arith.constant 3 : i32
    %7 = arith.muli %c3_i32_1, %2 : i32
    %c1_i32_2 = arith.constant 1 : i32
    %8 = arith.addi %7, %c1_i32_2 : i32
    %9 = arith.index_cast %8 : i32 to index
    %10 = memref.load %arg3[%9] : memref<6xf32, #tpu.memory_space<smem>>
    %c3_i32_3 = arith.constant 3 : i32
    %11 = arith.muli %c3_i32_3, %2 : i32
    %c2_i32 = arith.constant 2 : i32
    %12 = arith.addi %11, %c2_i32 : i32
    %13 = arith.index_cast %12 : i32 to index
    %14 = memref.load %arg3[%13] : memref<6xf32, #tpu.memory_space<smem>>
    %c6_i32 = arith.constant 6 : i32
    %15 = arith.muli %c6_i32, %2 : i32
    %c0_i32_4 = arith.constant 0 : i32
    %16 = arith.addi %15, %c0_i32_4 : i32
    %17 = arith.index_cast %16 : i32 to index
    %18 = memref.load %arg4[%17] : memref<12xf32, #tpu.memory_space<smem>>
    %c6_i32_5 = arith.constant 6 : i32
    %19 = arith.muli %c6_i32_5, %2 : i32
    %c1_i32_6 = arith.constant 1 : i32
    %20 = arith.addi %19, %c1_i32_6 : i32
    %21 = arith.index_cast %20 : i32 to index
    %22 = memref.load %arg4[%21] : memref<12xf32, #tpu.memory_space<smem>>
    %c6_i32_7 = arith.constant 6 : i32
    %23 = arith.muli %c6_i32_7, %2 : i32
    %c2_i32_8 = arith.constant 2 : i32
    %24 = arith.addi %23, %c2_i32_8 : i32
    %25 = arith.index_cast %24 : i32 to index
    %26 = memref.load %arg4[%25] : memref<12xf32, #tpu.memory_space<smem>>
    %c6_i32_9 = arith.constant 6 : i32
    %27 = arith.muli %c6_i32_9, %2 : i32
    %c3_i32_10 = arith.constant 3 : i32
    %28 = arith.addi %27, %c3_i32_10 : i32
    %29 = arith.index_cast %28 : i32 to index
    %30 = memref.load %arg4[%29] : memref<12xf32, #tpu.memory_space<smem>>
    %c6_i32_11 = arith.constant 6 : i32
    %31 = arith.muli %c6_i32_11, %2 : i32
    %c4_i32 = arith.constant 4 : i32
    %32 = arith.addi %31, %c4_i32 : i32
    %33 = arith.index_cast %32 : i32 to index
    %34 = memref.load %arg4[%33] : memref<12xf32, #tpu.memory_space<smem>>
    %c6_i32_12 = arith.constant 6 : i32
    %35 = arith.muli %c6_i32_12, %2 : i32
    %c5_i32 = arith.constant 5 : i32
    %36 = arith.addi %35, %c5_i32 : i32
    %37 = arith.index_cast %36 : i32 to index
    %38 = memref.load %arg4[%37] : memref<12xf32, #tpu.memory_space<smem>>
    %c0 = arith.constant 0 : index
    %c0_13 = arith.constant 0 : index
    %c0_14 = arith.constant 0 : index
    %c0_15 = arith.constant 0 : index
    %39 = vector.load %arg5[%c0, %c0_13, %c0_14, %c0_15] : memref<1x3x8x128xf32, #tpu.memory_space<vmem>>, vector<1x1x8x128xf32>
    %40 = vector.shape_cast %39 : vector<1x1x8x128xf32> to vector<8x128xf32>
    %c0_16 = arith.constant 0 : index
    %c1 = arith.constant 1 : index
    %c0_17 = arith.constant 0 : index
    %c0_18 = arith.constant 0 : index
    %41 = vector.load %arg5[%c0_16, %c1, %c0_17, %c0_18] : memref<1x3x8x128xf32, #tpu.memory_space<vmem>>, vector<1x1x8x128xf32>
    %42 = vector.shape_cast %41 : vector<1x1x8x128xf32> to vector<8x128xf32>
    %c0_19 = arith.constant 0 : index
    %c2 = arith.constant 2 : index
    %c0_20 = arith.constant 0 : index
    %c0_21 = arith.constant 0 : index
    %43 = vector.load %arg5[%c0_19, %c2, %c0_20, %c0_21] : memref<1x3x8x128xf32, #tpu.memory_space<vmem>>, vector<1x1x8x128xf32>
    %44 = vector.shape_cast %43 : vector<1x1x8x128xf32> to vector<8x128xf32>
    %45 = arith.addf %0, %40 : vector<8x128xf32>
    %46 = arith.addf %0, %42 : vector<8x128xf32>
    %47 = arith.addf %0, %44 : vector<8x128xf32>
    %48 = vector.broadcast %6 : f32 to vector<8x128xf32>
    %49 = arith.subf %40, %48 : vector<8x128xf32>
    %50 = vector.broadcast %10 : f32 to vector<8x128xf32>
    %51 = arith.subf %42, %50 : vector<8x128xf32>
    %52 = vector.broadcast %14 : f32 to vector<8x128xf32>
    %53 = arith.subf %44, %52 : vector<8x128xf32>
    %54 = vector.broadcast %18 : f32 to vector<8x128xf32>
    %55 = arith.mulf %54, %49 : vector<8x128xf32>
    %56 = vector.broadcast %22 : f32 to vector<8x128xf32>
    %57 = arith.mulf %56, %51 : vector<8x128xf32>
    %58 = arith.addf %55, %57 : vector<8x128xf32>
    %59 = vector.broadcast %26 : f32 to vector<8x128xf32>
    %60 = arith.mulf %59, %53 : vector<8x128xf32>
    %61 = arith.addf %58, %60 : vector<8x128xf32>
    %62 = arith.mulf %49, %61 : vector<8x128xf32>
    %63 = vector.broadcast %30 : f32 to vector<8x128xf32>
    %64 = arith.mulf %63, %51 : vector<8x128xf32>
    %65 = vector.broadcast %34 : f32 to vector<8x128xf32>
    %66 = arith.mulf %65, %53 : vector<8x128xf32>
    %67 = arith.addf %64, %66 : vector<8x128xf32>
    %68 = arith.mulf %51, %67 : vector<8x128xf32>
    %69 = arith.addf %62, %68 : vector<8x128xf32>
    %70 = arith.mulf %53, %53 : vector<8x128xf32>
    %71 = vector.broadcast %38 : f32 to vector<8x128xf32>
    %72 = arith.mulf %71, %70 : vector<8x128xf32>
    %73 = arith.addf %69, %72 : vector<8x128xf32>
    %cst_22 = arith.constant 1.000000e+00 : f32
    %74 = vector.broadcast %cst_22 : f32 to vector<8x128xf32>
    %75 = arith.subf %73, %74 : vector<8x128xf32>
    %cst_23 = arith.constant 0.000000e+00 : f32
    %76 = vector.broadcast %cst_23 : f32 to vector<8x128xf32>
    %77 = arith.maximumf %75, %76 : vector<8x128xf32>
    %78 = arith.addf %0, %77 : vector<8x128xf32>
    %79 = vector.shape_cast %45 : vector<8x128xf32> to vector<1x8x128xf32>
    %cst_24 = arith.constant dense<0.000000e+00> : vector<1xf32>
    %80 = vector.multi_reduction <add>, %79, %cst_24 [1, 2] : vector<1x8x128xf32> to vector<1xf32>
    %81 = vector.shape_cast %80 : vector<1xf32> to vector<1x1x1xf32>
    %82 = vector.extract %81[0, 0, 0] : f32 from vector<1x1x1xf32>
    %83 = vector.broadcast %82 : f32 to vector<1x128xf32>
    %c0_25 = arith.constant 0 : index
    %c0_26 = arith.constant 0 : index
    %c0_27 = arith.constant 0 : index
    %c0_28 = arith.constant 0 : index
    %c0_29 = arith.constant 0 : index
    %84 = vector.load %arg6[%c0_25, %c0_26, %c0_27, %c0_28, %c0_29] : memref<1x1x1x4x128xf32, #tpu.memory_space<vmem>>, vector<1x1x1x1x128xf32>
    %85 = vector.shape_cast %84 : vector<1x1x1x1x128xf32> to vector<1x128xf32>
    %86 = vector.shape_cast %83 : vector<1x128xf32> to vector<1x1x1x1x128xf32>
    tpu.vector_store %arg6[%c0_25, %c0_26, %c0_27, %c0_28, %c0_29], %86 {strides = array<i32>} : memref<1x1x1x4x128xf32, #tpu.memory_space<vmem>>, vector<1x1x1x1x128xf32>,
    %87 = vector.shape_cast %46 : vector<8x128xf32> to vector<1x8x128xf32>
    %cst_30 = arith.constant dense<0.000000e+00> : vector<1xf32>
    %88 = vector.multi_reduction <add>, %87, %cst_30 [1, 2] : vector<1x8x128xf32> to vector<1xf32>
    %89 = vector.shape_cast %88 : vector<1xf32> to vector<1x1x1xf32>
    %90 = vector.extract %89[0, 0, 0] : f32 from vector<1x1x1xf32>
    %91 = vector.broadcast %90 : f32 to vector<1x128xf32>
    %c0_31 = arith.constant 0 : index
    %c0_32 = arith.constant 0 : index
    %c0_33 = arith.constant 0 : index
    %c1_34 = arith.constant 1 : index
    %c0_35 = arith.constant 0 : index
    %92 = vector.load %arg6[%c0_31, %c0_32, %c0_33, %c1_34, %c0_35] : memref<1x1x1x4x128xf32, #tpu.memory_space<vmem>>, vector<1x1x1x1x128xf32>
    %93 = vector.shape_cast %92 : vector<1x1x1x1x128xf32> to vector<1x128xf32>
    %94 = vector.shape_cast %91 : vector<1x128xf32> to vector<1x1x1x1x128xf32>
    tpu.vector_store %arg6[%c0_31, %c0_32, %c0_33, %c1_34, %c0_35], %94 {strides = array<i32>} : memref<1x1x1x4x128xf32, #tpu.memory_space<vmem>>, vector<1x1x1x1x128xf32>,
    %95 = vector.shape_cast %47 : vector<8x128xf32> to vector<1x8x128xf32>
    %cst_36 = arith.constant dense<0.000000e+00> : vector<1xf32>
    %96 = vector.multi_reduction <add>, %95, %cst_36 [1, 2] : vector<1x8x128xf32> to vector<1xf32>
    %97 = vector.shape_cast %96 : vector<1xf32> to vector<1x1x1xf32>
    %98 = vector.extract %97[0, 0, 0] : f32 from vector<1x1x1xf32>
    %99 = vector.broadcast %98 : f32 to vector<1x128xf32>
    %c0_37 = arith.constant 0 : index
    %c0_38 = arith.constant 0 : index
    %c0_39 = arith.constant 0 : index
    %c2_40 = arith.constant 2 : index
    %c0_41 = arith.constant 0 : index
    %100 = vector.load %arg6[%c0_37, %c0_38, %c0_39, %c2_40, %c0_41] : memref<1x1x1x4x128xf32, #tpu.memory_space<vmem>>, vector<1x1x1x1x128xf32>
    %101 = vector.shape_cast %100 : vector<1x1x1x1x128xf32> to vector<1x128xf32>
    %102 = vector.shape_cast %99 : vector<1x128xf32> to vector<1x1x1x1x128xf32>
    tpu.vector_store %arg6[%c0_37, %c0_38, %c0_39, %c2_40, %c0_41], %102 {strides = array<i32>} : memref<1x1x1x4x128xf32, #tpu.memory_space<vmem>>, vector<1x1x1x1x128xf32>,
    %103 = vector.shape_cast %78 : vector<8x128xf32> to vector<1x8x128xf32>
    %cst_42 = arith.constant dense<0.000000e+00> : vector<1xf32>
    %104 = vector.multi_reduction <add>, %103, %cst_42 [1, 2] : vector<1x8x128xf32> to vector<1xf32>
    %105 = vector.shape_cast %104 : vector<1xf32> to vector<1x1x1xf32>
    %106 = vector.extract %105[0, 0, 0] : f32 from vector<1x1x1xf32>
    %107 = vector.broadcast %106 : f32 to vector<1x128xf32>
    %c0_43 = arith.constant 0 : index
    %c0_44 = arith.constant 0 : index
    %c0_45 = arith.constant 0 : index
    %c3 = arith.constant 3 : index
    %c0_46 = arith.constant 0 : index
    %108 = vector.load %arg6[%c0_43, %c0_44, %c0_45, %c3, %c0_46] : memref<1x1x1x4x128xf32, #tpu.memory_space<vmem>>, vector<1x1x1x1x128xf32>
    %109 = vector.shape_cast %108 : vector<1x1x1x1x128xf32> to vector<1x128xf32>
    %110 = vector.shape_cast %107 : vector<1x128xf32> to vector<1x1x1x1x128xf32>
    tpu.vector_store %arg6[%c0_43, %c0_44, %c0_45, %c3, %c0_46], %110 {strides = array<i32>} : memref<1x1x1x4x128xf32, #tpu.memory_space<vmem>>, vector<1x1x1x1x128xf32>,
    return
  }
  func.func @transform_0(%arg0: i32, %arg1: i32, %arg2: i32) -> i32 {
    %c0_i32 = arith.constant 0 : i32
    %c0_i32_0 = arith.constant 0 : i32
    return %c0_i32 : i32
  }
  func.func @transform_1(%arg0: i32, %arg1: i32, %arg2: i32) -> i32 {
    %c0_i32 = arith.constant 0 : i32
    %c0_i32_0 = arith.constant 0 : i32
    return %c0_i32 : i32
  }
  func.func @transform_2(%arg0: i32, %arg1: i32, %arg2: i32) -> (i32, i32, i32, i32) {
    %c1_i32 = arith.constant 1 : i32
    %0 = arith.muli %arg1, %c1_i32 : i32
    %1 = arith.addi %0, %arg2 : i32
    %c0_i32 = arith.constant 0 : i32
    %c0_i32_0 = arith.constant 0 : i32
    %c0_i32_1 = arith.constant 0 : i32
    return %arg0, %c0_i32, %1, %c0_i32_0 : i32, i32, i32, i32
  }
  func.func @transform_3(%arg0: i32, %arg1: i32, %arg2: i32) -> (i32, i32, i32, i32, i32) {
    %c0_i32 = arith.constant 0 : i32
    %c0_i32_0 = arith.constant 0 : i32
    %c0_i32_1 = arith.constant 0 : i32
    %c0_i32_2 = arith.constant 0 : i32
    return %arg0, %arg1, %c0_i32, %c0_i32_0, %c0_i32_1 : i32, i32, i32, i32, i32
  }
}

</mosaic_0001>

<bundles_post_ra>
// kernel: tpu_custom_call.1
= control target key start
LH: loop header
LB: loop body
LE: loop exit
PB: predicated region body
PF: predicated region fallthrough
CT: control target
= control target key end

     0   :  { %s975_s0 = inlined_call_operand.hbm [shape: f32[6], index: 0, kind: input, shape index: {}]   ;;  %s976_s1 = inlined_call_operand.vmem [shape: f32[12], index: 1, kind: input, shape index: {}]   ;;  %s977_s2 = inlined_call_operand.hbm [shape: f32[2,3,8,128], index: 2, kind: input, shape index: {}]   ;;  %s978_s3 = inlined_call_operand.hbm [shape: f32[2,1,1,4,128], index: 3, kind: output, shape index: {}]  }
   0x1   :  { %983 = sst [smem:[#allocation15_spill]] %s975_s0 }
   0x2   :  { %984 = sst [smem:[#allocation16_spill]] %s976_s1 }
   0x3   :  { %8 = vsyncpa [#allocation6], 0 }
   0x4   :  { %9 = vsyncpa [#allocation7], 0 }
   0x5   :  { %10 = vsyncpa [#allocation4], 0 }
   0x6   :  { %12 = vsyncpa [#allocation4 + $0x1], 0 }
   0x7   :  { %13 = vsyncpa [#allocation5], 0 }
   0x8   :  { %15 = vsyncpa [#allocation5 + $0x1], 0  ;;  %s752_s12 = smov 0   ;;  %s754_s13 = smov 0  }
   0x9   :  { %s756_s14 = smov 0   ;;  %s758_s15 = smov 0  }
   0xa   :  { %s760_s16 = smov 0   ;;  %s762_s17 = smov 0  }
   0xb LB: > { %s462_s18 = sadd.s32 4294967295, %s724_s17   ;;  %s463_s19 = sadd.s32 4294967294, %s724_s17   ;;  %s724_s17 = sphi %s762_s17, %s21_s17   ;;  %s720_s16 = sphi %s760_s16, %s1003_s16   ;;  %s716_s15 = sphi %s758_s15, %s1002_s15   ;;  %s712_s14 = sphi %s756_s14, %s1001_s14   ;;  %s708_s13 = sphi %s754_s13, %s1000_s13   ;;  %s704_s12 = sphi %s752_s12, %s999_s12  }
   0xc   : > { %s93_s20 = sadd.s32 1, %s712_s14  ;;  %p100_p0 = scmp.ne.s32.totalorder %s712_s14, %s708_s13 }
   0xd   : > { %p101_p1 = scmp.eq.s32.totalorder %s724_s17, 0  ;;  %p106_p2 = scmp.ne.s32.totalorder %s708_s13, %s704_s12 }
   0xe   : > { %p790_p3 = scmp.eq.s32.totalorder %s462_s18, 0  ;;  %p132_p4 = scmp.eq.s32.totalorder %s462_s18, 1 }
   0xf   : > { %p102_p5 = por %p101_p1, %p100_p0  ;;  %p138_p6 = scmp.eq.s32.totalorder %s463_s19, 1 }
  0x10   : > { %s985_s21 = scalar_select %p790_p3, 1, 0 }
  0x11   : > { %p796_p7 = por %p790_p3, %p106_p2  ;;  %p800_p8 = por %p132_p4, %p100_p0 }
  0x12   : > { %p804_p9 = por %p138_p6, %p106_p2  ;;  %p464_p10 = scmp.ge.s32.totalorder %s724_s17, 1 }
  0x13   : > { %s986_s22 = scalar_select %p796_p7, 1, 0 }
  0x14   : > { %s987_s23 = scalar_select %p800_p8, 1, 0 }
  0x15   : > { %s988_s24 = scalar_select %p804_p9, 1, 0 }
  0x16   : > { %p145_p11 = scmp.lt.s32.totalorder %s724_s17, 3  ;;  %p520_p1 = scmp.lt.s32.totalorder %s724_s17, 2 }
  0x17   : > { %s990_s1 = sld [smem:[#allocation16_spill]]  ;;  %s178_s4 = sand.u32 1, %s712_s14  }
  0x18   : > { %p811_p13 = pnand %p464_p10, %p145_p11  ;;  %p821_p4 = pnand %p520_p1, %p102_p5 }
  0x19   : > { %s40_s5 = sadd.s32 1, %s720_s16  ;;  %s993_s0 = sld [smem:[#allocation15_spill]] }
  0x1a   : > { %p503_p0 = pneg %p811_p13 }
  0x1c   : > { %p827_p2 = pnand %p503_p0, %p790_p3 }
  0x1d   : > { %s167_s28 = sshll.u32 %s990_s1, 4  ;;  %s168_s28 = int_to_ptr.vmem [resolvable:$true] %s167_s28 }
  0x1e   : > { %p578_p6 = pneg %p827_p2 }
  0x1f   : > { %s576_s8 = scalar_lea.hbm %s993_s0, 16 }
  0x20   : > { %p577_p5 = scmp.ne.s32.totalorder %s993_s0, %s576_s8  ;;  %p583_p1 = scmp.lt.u32.totalorder %s576_s8, %s993_s0 }
  0x22   : > { %p579_p10 = pnand %p578_p6, %p577_p5 }
  0x24   : > { %p580_p11 = pneg %p579_p10 }
  0x26   : > { %p585_p0 = pnand %p583_p1, %p580_p11 }
  0x28   : > { %588 = shalt.err (!%p585_p0)
}
  0x29   : > { %s726_s19 = smov [#allocation3]   ;;  %s589_s6 = scalar_lea.vmem %s168_s28, 16 }
  0x2a   : > { %506 = dma.hbm_to_smem (!%p827_p2), %s993_s0, 16, %s726_s19, [#allocation6]  }
  0x2b   : > { %p590_p12 = scmp.ne.s32.totalorder %s168_s28, %s589_s6  ;;  %p597_p7 = scmp.lt.s32.totalorder %s168_s28, %s168_s28 }
  0x2c   : > { %p598_p5 = scmp.lt.s32.totalorder %s589_s6, %s589_s6 }
  0x2d   : > { %p592_p9 = pnand %p590_p12, %p578_p6 }
  0x2e   : > { %p599_p10 = por %p598_p5, %p597_p7 }
  0x2f   : > { %p593_p8 = pneg %p592_p9 }
  0x31   : > { %p600_p3 = pnand %p599_p10, %p593_p8 }
  0x33   : > { %603 = shalt.err (!%p600_p3)
}
  0x34   : > { %s727_s7 = smov [#allocation8]   ;;  %p42_p11 = scmp.ge.s32.totalorder %s40_s5, 2 }
  0x35   : > { %509 = dma.vmem_to_smem (!%p827_p2), %s168_s28, 16, %s727_s7, [#allocation7]  }
  0x36   : > { %s480_s8 = smul.u32 24, %s178_s4  ;;  %s1005_s5 = smov (%p42_p11, %s40_s5), 0 }
  0x37   : > { %s481_s9 = smul.u32 384, %s720_s16  ;;  %s88_s10 = ssub.s32 %s720_s16, %s1005_s5 }
  0x38   : > { %s182_s11 = scalar_lea.vmem [#allocation9], %s480_s8  ;;  %p91_p3 = scmp.eq.s32.totalorder %s88_s10, 0 }
  0x39   : > { %s191_s18 = sshll.u32 %s182_s11, 4  ;;  %s861_s26 = scalar_lea.hbm %s977_s2, %s481_s9  ;;  %s863_s18 = int_to_ptr.vmem [resolvable:$true] %s191_s18 }
  0x3a   : > { %s868_s28 = scalar_select %p91_p3, %s712_s14, %s93_s20  }
  0x3b   : > { %s872_s27 = scalar_lea.sflag [#allocation4], %s178_s4  ;;  %s604_s6 = scalar_lea.hbm %s861_s26, 384 }
  0x3c   : > { %p605_p7 = scmp.ne.s32.totalorder %s861_s26, %s604_s6  ;;  %p606_p8 = pneg %p821_p4 }
  0x3d   : > { %s609_s9 = scalar_lea.hbm %s977_s2, 768  ;;  %p610_p2 = scmp.lt.u32.totalorder %s861_s26, %s977_s2 }
  0x3e   : > { %p607_p9 = pnand %p606_p8, %p605_p7  ;;  %p611_p6 = scmp.lt.u32.totalorder %s609_s9, %s604_s6 }
  0x3f   : > { %p613_p0 = scmp.lt.u32.totalorder %s604_s6, %s861_s26 }
  0x40   : > { %p608_p12 = pneg %p607_p9  ;;  %p612_p1 = por %p611_p6, %p610_p2 }
  0x42   : > { %p614_p5 = por %p613_p0, %p612_p1 }
  0x44   : > { %p615_p10 = pnand %p614_p5, %p608_p12 }
  0x46   : > { %618 = shalt.err (!%p615_p10)
}
  0x47   : > { %s619_s20 = scalar_lea.vmem %s863_s18, 384  ;;  %s728_s4 = smov [#allocation9]  }
  0x48   : > { %p620_p11 = scmp.ne.s32.totalorder %s863_s18, %s619_s20  ;;  %s624_s30 = sshll.u32 %s728_s4, 4  ;;  %s625_s30 = int_to_ptr.vmem [resolvable:$false] %s624_s30 }
  0x49   : > { %s626_s19 = scalar_lea.vmem %s625_s30, 768  ;;  %p627_p9 = scmp.lt.s32.totalorder %s863_s18, %s625_s30 }
  0x4a   : > { %p622_p3 = pnand %p620_p11, %p606_p8  ;;  %p628_p2 = scmp.lt.s32.totalorder %s626_s19, %s619_s20 }
  0x4c   : > { %p623_p7 = pneg %p622_p3  ;;  %p629_p6 = por %p628_p2, %p627_p9 }
  0x4e   : > { %p630_p1 = pnand %p629_p6, %p623_p7 }
  0x50   : > { %633 = shalt.err (!%p630_p1)
}
  0x51   : > { %s729_s6 = smov 128   ;;  %s730_s7 = smov 8  }
  0x52   : > { %513 = dma.hbm_to_vmem [thread:$0]  (!%p821_p4), %s861_s26, 384, %s863_s18, %s872_s27, %s729_s6, %s729_s6, %s730_s7  }
  0x53   : > { %203 = sbr.rel (%p811_p13) target bundleno = 351 (0x15f), region = 32  ;;  %p994_p8 = scmp.ne.s32.totalorder (!%p811_p13), %s985_s21, 0 }
  0x5a   : > { %687 = dma.done.wait (%p994_p8), [#allocation6], 16  }
  0x5b   : > { %689 = vsyncadd (%p994_p8), [#allocation6], 4294967280 }
  0x5c   : > { %691 = dma.done.wait (%p994_p8), [#allocation7], 16  }
  0x5d   : > { %693 = vsyncadd (%p994_p8), [#allocation7], 4294967280  ;;  %s911_s8 = sand.u32 1, %s708_s13   ;;  %p995_p13 = scmp.ne.s32.totalorder %s986_s22, 0 }
  0x5e   : > { %s482_s25 = smul.u32 24, %s911_s8  ;;  %s214_s29 = scalar_lea.sflag [#allocation4], %s911_s8 }
  0x60   : > { %s217_s18 = scalar_lea.vmem [#allocation9], %s482_s25 }
  0x61   : > { %695 = dma.done.wait (%p995_p13), %s214_s29, 384  }
  0x62   : > { %697 = vsyncadd (%p995_p13), %s214_s29, 4294966912 }
  0x63   : > { %222 = sfence }
  0x64   : > { %v260_v0 = vld [vmem:[%s217_s18] sm:$0xff]  ;;  %s242_s21 = smul.u32 3, %s716_s15  ;;  %v474_v1 = vld [vmem:[%s217_s18 + $0x10] sm:$0xff]  ;;  %v473_v2 = vld [vmem:[%s217_s18 + $0x8] sm:$0xff]  ;;  %p996_p12 = scmp.ne.s32.totalorder %s987_s23, 0 }
  0x65   : > { %297 = vadd.xlane.f32.xlu0 %v260_v0  ;;  %s248_s26 = smul.u32 6, %s716_s15  ;;  %319 = vadd.xlane.f32.xlu1 %v474_v1 }
  0x66   : > { %s243_s27 = sld [smem:[#allocation3 + %s242_s21]]  ;;  %s246_s9 = sadd.s32 2, %s242_s21 }
  0x67   : > { %s249_s10 = sld [smem:[#allocation8 + %s248_s26]]  ;;  %s252_s20 = sadd.s32 2, %s248_s26 }
  0x68   : > { %s247_s11 = sld [smem:[#allocation3 + %s246_s9]]  ;;  %s256_s4 = sadd.s32 4, %s248_s26 }
  0x69   : > { %s253_s30 = sld [smem:[#allocation8 + %s252_s20]]  ;;  %308 = vadd.xlane.f32.xlu0 %v473_v2  ;;  %s244_s22 = sadd.s32 1, %s242_s21 }
  0x6a   : > { %s257_s19 = sld [smem:[#allocation8 + %s256_s4]]  ;;  %s250_s6 = sadd.s32 1, %s248_s26 }
  0x6b   : > { %s245_s7 = sld [smem:[#allocation3 + %s244_s22]]  ;;  %s254_s29 = sadd.s32 3, %s248_s26 }
  0x6c   : > { %s251_s25 = sld [smem:[#allocation8 + %s250_s6]]  ;;  %v268_v3 = vstv %s243_s27  ;;  %s258_s0 = sadd.s32 5, %s248_s26 }
  0x6d   : > { %s255_s1 = sld [smem:[#allocation8 + %s254_s29]]  ;;  %v269_v5 = vsub.f32 %v260_v0, %v268_v3  ;;  %v274_v7 = vstv %s249_s10  ;;  %s477_s27 = sshll.u32 %s716_s15, 6 }
  0x6e   : > { %v272_v4 = vstv %s247_s11  ;;  %s259_s9 = sld [smem:[#allocation8 + %s258_s0]]  ;;  %s472_s0 = sshll.u32 %s911_s8, 2 }
  0x6f   : > { %v273_v6 = vsub.f32 %v474_v1, %v272_v4  ;;  %v279_v9 = vstv %s253_s30  ;;  %v275_v12 = vmul.f32 %v274_v7, %v269_v5  ;;  %s240_s18 = scalar_lea.vmem [#allocation10], %s472_s0  ;;  %s926_s4 = scalar_lea.hbm %s978_s3, %s477_s27 }
  0x70   : > { %v285_v8 = vstv %s257_s19  ;;  %s356_s10 = sshll.u32 %s240_s18, 4  ;;  %s342_s19 = scalar_lea.sflag [#allocation5], %s911_s8  ;;  %s928_s10 = int_to_ptr.vmem [resolvable:$true] %s356_s10 }
  0x71   : > { %v270_v10 = vstv %s245_s7  ;;  %v286_v13 = vmul.f32 %v285_v8, %v273_v6  ;;  %v280_v16 = vmul.f32 %v279_v9, %v273_v6  ;;  %v290_v19 = vmul.f32 %v273_v6, %v273_v6  ;;  %s634_s22 = scalar_lea.vmem %s928_s10, 64  ;;  %s731_s15 = smov [#allocation10]  }
  0x72   : > { %v276_v11 = vstv %s251_s25  ;;  %v271_v14 = vsub.f32 %v473_v2, %v270_v10  ;;  %p635_p4 = scmp.ne.s32.totalorder %s928_s10, %s634_s22  ;;  %s638_s6 = sshll.u32 %s731_s15, 4  ;;  %s639_s6 = int_to_ptr.vmem [resolvable:$false] %s638_s6 }
  0x73   : > { %v283_v15 = vstv %s255_s1  ;;  %s640_s7 = scalar_lea.vmem %s639_s6, 128  ;;  %p641_p10 = scmp.lt.s32.totalorder %s928_s10, %s639_s6 }
  0x74   : > { %v277_v17 = vmul.f32 %v276_v11, %v271_v14  ;;  %v284_v18 = vmul.f32 %v283_v15, %v271_v14  ;;  %v291_v22 = vstv %s259_s9  ;;  %p636_p0 = pnand %p635_p4, %p996_p12  ;;  %p642_p11 = scmp.lt.s32.totalorder %s640_s7, %s634_s22 }
  0x75   : > { %v292_v26 = vmul.f32 %v291_v22, %v290_v19 }
  0x76   : > { %v278_v20 = vadd.f32 %v277_v17, %v275_v12  ;;  %v287_v21 = vadd.f32 %v286_v13, %v284_v18  ;;  %p637_p5 = pneg %p636_p0  ;;  %p643_p3 = por %p642_p11, %p641_p10 }
  0x78   : > { %v288_v23 = vmul.f32 %v287_v21, %v271_v14  ;;  %v281_v24 = vadd.f32 %v280_v16, %v278_v20  ;;  %p644_p7 = pnand %p643_p3, %p637_p5 }
  0x7a   : > { %v282_v25 = vmul.f32 %v281_v24, %v269_v5 }
  0x7c   : > { %v289_v27 = vadd.f32 %v288_v23, %v282_v25 }
  0x7e   : > { %v293_v28 = vadd.f32 %v292_v26, %v289_v27 }
  0x80   : > { %v475_v29 = vadd.f32 -1.0, %v293_v28 }
  0x82   : > { %v295_v30 = vmax.f32 %v475_v29, 0.0 }
  0x84   : > { %330 = vadd.xlane.f32.xlu1 %v295_v30 }
  0xf2   : > { %v298_v31 = vpop.xlane.xlu0 %297  ;;  %v320_v32 = vpop.xlane.xlu1 %319 }
  0xf3   : > { %v299_v33 = vrot.slane %v298_v31, 4  ;;  %v321_v34 = vrot.slane %v320_v32, 4 }
  0xf5   : > { %v300_v35 = vadd.f32 %v299_v33, %v298_v31  ;;  %v322_v36 = vadd.f32 %v321_v34, %v320_v32 }
  0xf6   : > { %v309_v37 = vpop.xlane.xlu0 %308 }
  0xf7   : > { %v301_v38 = vrot.slane %v300_v35, 2  ;;  %v323_v39 = vrot.slane %v322_v36, 2  ;;  %v310_v40 = vrot.slane %v309_v37, 4 }
  0xf9   : > { %v311_v41 = vadd.f32 %v310_v40, %v309_v37  ;;  %v302_v42 = vadd.f32 %v301_v38, %v300_v35  ;;  %v324_v43 = vadd.f32 %v323_v39, %v322_v36 }
  0xfb   : > { %v312_v44 = vrot.slane %v311_v41, 2  ;;  %v303_v45 = vrot.slane %v302_v42, 1  ;;  %v325_v46 = vrot.slane %v324_v43, 1 }
  0xfd   : > { %v313_v47 = vadd.f32 %v312_v44, %v311_v41  ;;  %v304_v48 = vadd.f32 %v303_v45, %v302_v42  ;;  %v326_v50 = vadd.f32 %v325_v46, %v324_v43 }
  0xff   : > { %483 = vpush %v304_v48  ;;  %v314_v49 = vrot.slane %v313_v47, 1 }
 0x101   : > { %v315_v51 = vadd.f32 %v314_v49, %v313_v47 }
 0x103   : > { %485 = vpush %v315_v51 }
 0x104   : > { %487 = vpush %v326_v50 }
 0x111   : > { %v331_v52 = vpop.xlane.xlu1 %330 }
 0x112   : > { %v332_v53 = vrot.slane %v331_v52, 4 }
 0x114   : > { %v333_v54 = vadd.f32 %v332_v53, %v331_v52 }
 0x116   : > { %v334_v55 = vrot.slane %v333_v54, 2 }
 0x118   : > { %v335_v56 = vadd.f32 %v334_v55, %v333_v54 }
 0x11a   : > { %v336_v57 = vrot.slane %v335_v56, 1 }
 0x11c   : > { %v337_v58 = vadd.f32 %v336_v57, %v335_v56 }
 0x11e   : > { %489 = vpush %v337_v58 }
 0x130   : > { %s484_s1 = spop %483 }
 0x131   : > { %v306_v59 = vstv %s484_s1 }
 0x132   : > { %307 = vst [vmem:[%s240_s18] sm:$0x1] %v306_v59 }
 0x134   : > { %s486_s21 = spop %485 }
 0x135   : > { %v317_v60 = vstv %s486_s21  ;;  %s488_s26 = spop %487 }
 0x136   : > { %318 = vst [vmem:[%s240_s18 + $0x1] sm:$0x1] %v317_v60  ;;  %v328_v61 = vstv %s488_s26 }
 0x137   : > { %329 = vst [vmem:[%s240_s18 + $0x2] sm:$0x1] %v328_v61 }
 0x14f   : > { %s490_s30 = spop %489 }
 0x150   : > { %v339_v62 = vstv %s490_s30 }
 0x151   : > { %340 = vst [vmem:[%s240_s18 + $0x3] sm:$0x1] %v339_v62 }
 0x152   : > { %647 = shalt.err (!%p644_p7)
}
 0x153   : > { %s648_s8 = scalar_lea.hbm %s926_s4, 64  ;;  %s652_s9 = scalar_lea.hbm %s978_s3, 128 }
 0x154   : > { %p649_p9 = scmp.ne.s32.totalorder %s926_s4, %s648_s8  ;;  %p653_p1 = scmp.lt.u32.totalorder %s926_s4, %s978_s3 }
 0x155   : > { %p654_p8 = scmp.lt.u32.totalorder %s652_s9, %s648_s8  ;;  %p656_p4 = scmp.lt.u32.totalorder %s648_s8, %s926_s4 }
 0x156   : > { %p650_p2 = pnand %p649_p9, %p996_p12 }
 0x157   : > { %p655_p13 = por %p654_p8, %p653_p1 }
 0x158   : > { %p651_p6 = pneg %p650_p2 }
 0x159   : > { %p657_p0 = por %p656_p4, %p655_p13 }
 0x15b   : > { %p658_p5 = pnand %p657_p0, %p651_p6 }
 0x15d   : > { %661 = shalt.err (!%p658_p5)
}
 0x15e   : > { %501 = dma.vmem_to_hbm [thread:$0]  (%p996_p12), %s928_s10, 64, %s926_s4, %s342_s19  }
 0x15f PF: > { %s368_s18 = sand.u32 1, %s704_s12   ;;  %p997_p10 = scmp.ne.s32.totalorder %s988_s24, 0 }
 0x160   : > { %p998_p11 = scmp.ge.s32.totalorder %s724_s17, 2  ;;  %s369_s21 = scalar_lea.sflag [#allocation5], %s368_s18 }
 0x162   : > { %p515_p3 = pnand %p998_p11, %p997_p10 }
 0x164   : > { %699 = dma.done.wait (!%p515_p3), %s369_s21, 64  }
 0x165   : > { %701 = vsyncadd (!%p515_p3), %s369_s21, 4294967232  ;;  %s21_s17 = sadd.s32 1, %s724_s17   ;;  %s999_s12 = smov %s708_s13 }
 0x166   : > { %p18_p7 = scmp.ge.s32.totalorder %s21_s17, 4   ;;  %s1000_s13 = smov %s712_s14 }
 0x167   : > { %s1001_s14 = smov %s868_s28  ;;  %s1002_s15 = smov %s720_s16 }
 0x168   : > { %s1003_s16 = smov %s1005_s5  ;;  %20 = sbr.rel (!%p18_p7) target bundleno = 11 (0xb), region = 89 }
 0x16f   :  { %374 = vsyncpa [#allocation4], 1 }
 0x170   :  { %376 = vsyncpa [#allocation4 + $0x1], 1 }
 0x171   :  { %377 = vsyncpa [#allocation5], 1 }
 0x172   :  { %379 = vsyncpa [#allocation5 + $0x1], 1 }
 0x173   :  { %380 = vsyncpa [#allocation6], 1 }
 0x174   :  { %382 = vsyncpa [#allocation6 + $0x1], 1 }
 0x175   :  { %383 = vsyncpa [#allocation7], 1 }
 0x176   :  { %385 = vsyncpa [#allocation7 + $0x1], 1 }

</bundles_post_ra>
